<compile_context>
chip_gen: v6e
topology: v6e:2x2x1
jax: 0.10.0
libtpu: 0.0.40
codegen_flags: <defaults>
</compile_context>

<pallas_src>
import functools

import jax
import jax.numpy as jnp
from jax.experimental import pallas as pl
from jax.experimental.pallas import tpu as pltpu


def _round_up(n, m):
    return ((n + m - 1) // m) * m


def highway_kernel(x_ref, w_ref, b_ref, o_ref, *, approx_sigmoid):
    """One batch tile of the highway cell.

    x_ref : (tm, Fp)      activations in the matmul dtype (bf16 by default)
    w_ref : (Fp, 2*Fp)    fused [Wt.T | Wg.T] in the matmul dtype (VMEM-resident)
    b_ref : (1, 2*Fp)     fused [bt | bg] in f32 (VMEM-resident)
    o_ref : (tm, Fp)      output tile
    """
    Fp = o_ref.shape[-1]
    x = x_ref[...]

    # Single fused GEMM for both branches; f32 accumulation on the MXU.
    z = jnp.dot(x, w_ref[...], preferred_element_type=jnp.float32) + b_ref[...]

    # Static, lane-aligned split (Fp is always a multiple of 128).
    t = jnp.maximum(z[:, :Fp], 0.0)          # relu(transform(x))
    zg = z[:, Fp:]
    denom = 1.0 + jnp.exp(-zg)               # exp -> EUP slot
    if approx_sigmoid:
        g = pl.reciprocal(denom, approx=True)    # EUP vrcp; VALU stays free
    else:
        g = 1.0 / denom                          # exact divide (validation path)

    # Highway combine rewritten as x + g*(t - x): identical algebra, one fewer vmul.
    x_f32 = x.astype(jnp.float32)
    o_ref[...] = (x_f32 + g * (t - x_f32)).astype(o_ref.dtype)


def prepare_highway_params(wt, bt, wg, bg, *, matmul_dtype=jnp.bfloat16):
    """Fuse the two nn.Linear params into one (Fp, 2*Fp) weight + (1, 2*Fp) bias.

    wt, wg : (F, F) in PyTorch nn.Linear layout (out_features, in_features)
    bt, bg : (F,)

    F is zero-padded to the next multiple of 128 so the in-kernel t/g split is
    lane-aligned (pad gate logits are 0 -> g=0.5; pad x columns are 0 -> pad
    output is 0 and is sliced off).  Call this ONCE per parameter set and reuse
    the result across calls (avoids per-call transpose/concat/cast traffic).
    """
    F = wt.shape[0]
    Fp = _round_up(F, 128)
    pad = Fp - F
    wt_t = jnp.pad(wt.T, ((0, pad), (0, pad)))
    wg_t = jnp.pad(wg.T, ((0, pad), (0, pad)))
    w_cat = jnp.concatenate([wt_t, wg_t], axis=1).astype(matmul_dtype)   # (Fp, 2*Fp)
    b_cat = jnp.concatenate([jnp.pad(bt, (0, pad)), jnp.pad(bg, (0, pad))])
    b_cat = b_cat.reshape(1, 2 * Fp).astype(jnp.float32)                 # (1, 2*Fp)
    return w_cat, b_cat


def highway_cell_fused(x, w_cat, b_cat, *, tile_m=512, out_dtype=None,
                       approx_sigmoid=True):
    """Highway cell forward with pre-fused params (see prepare_highway_params).

    x : (B, F).  Output is (B, F) in `out_dtype` (defaults to the matmul dtype,
    i.e. bf16 writeback, per perf review; pass out_dtype=x.dtype to keep f32).
    """
    B, F = x.shape
    Fp = w_cat.shape[0]
    assert w_cat.shape == (Fp, 2 * Fp) and Fp >= F and Fp % 128 == 0
    assert b_cat.shape == (1, 2 * Fp)
    matmul_dtype = w_cat.dtype
    out_dtype = matmul_dtype if out_dtype is None else out_dtype

    x_mm = x.astype(matmul_dtype)
    if Fp != F:
        x_mm = jnp.pad(x_mm, ((0, 0), (0, Fp - F)))

    # Batch tiling: large tiles amortize per-step overhead; multiple of 16 for
    # bf16 sublane packing.  Pad B to a tile multiple and slice the pad off.
    tm = min(tile_m, _round_up(B, 16))
    B_pad = _round_up(B, tm)
    if B_pad != B:
        x_mm = jnp.pad(x_mm, ((0, B_pad - B), (0, 0)))

    grid = (B_pad // tm,)

    # Scoped VMEM budget: resident weight + bias, double-buffered x / out tiles,
    # plus headroom for compiler scratch.
    mm_bytes = jnp.dtype(matmul_dtype).itemsize
    out_bytes = jnp.dtype(out_dtype).itemsize
    kernel_bytes = (Fp * 2 * Fp * mm_bytes          # fused weight (single buffer)
                    + 2 * Fp * 4                    # fused bias
                    + 2 * tm * Fp * mm_bytes        # x tiles (double-buffered)
                    + 2 * tm * Fp * out_bytes)      # out tiles (double-buffered)
    vmem_limit = int(min(64 * 1024 * 1024,
                         max(2 * kernel_bytes + (4 << 20), 16 << 20)))

    kernel = functools.partial(highway_kernel, approx_sigmoid=approx_sigmoid)

    def _build(single_buffer_params):
        resident_kw = (dict(pipeline_mode=pl.Buffered(buffer_count=1))
                       if single_buffer_params else {})
        return pl.pallas_call(
            kernel,
            out_shape=jax.ShapeDtypeStruct((B_pad, Fp), out_dtype),
            grid_spec=pltpu.PrefetchScalarGridSpec(
                num_scalar_prefetch=0,
                grid=grid,
                in_specs=[
                    # x tile streams with default double buffering.
                    pl.BlockSpec((tm, Fp), lambda i: (i, 0)),
                    # Grid-invariant weight / bias: single-buffered resident copies.
                    pl.BlockSpec((Fp, 2 * Fp), lambda i: (0, 0), **resident_kw),
                    pl.BlockSpec((1, 2 * Fp), lambda i: (0, 0), **resident_kw),
                ],
                out_specs=pl.BlockSpec((tm, Fp), lambda i: (i, 0)),
            ),
            compiler_params=pltpu.CompilerParams(
                dimension_semantics=("parallel",),
                vmem_limit_bytes=vmem_limit,
            ),
        )

    try:
        out = _build(True)(x_mm, w_cat, b_cat)
        out = jax.block_until_ready(out)
    except Exception:
        # pipeline_mode=Buffered(1) not accepted by this jax version at the
        # top-level pallas_call; fall back to default double-buffering (costs
        # one redundant weight copy in VMEM, correctness unchanged).
        out = _build(False)(x_mm, w_cat, b_cat)

    if B_pad != B or Fp != F:
        out = out[:B, :F]
    return out


def highway_cell(x, wt, bt, wg, bg, *, tile_m=512, matmul_dtype=jnp.bfloat16,
                 out_dtype=None, approx_sigmoid=True):
    """Convenience wrapper: fuses params on the fly (prefer prepare_highway_params
    + highway_cell_fused when calling repeatedly with the same parameters)."""
    w_cat, b_cat = prepare_highway_params(wt, bt, wg, bg, matmul_dtype=matmul_dtype)
    return highway_cell_fused(x, w_cat, b_cat, tile_m=tile_m, out_dtype=out_dtype,
                              approx_sigmoid=approx_sigmoid)


def highway_ref(x, wt, bt, wg, bg):
    t = jnp.maximum(x @ wt.T + bt, 0.0)
    g = jax.nn.sigmoid(x @ wg.T + bg)
    return t * g + x * (1.0 - g)


if __name__ == "__main__":
    feature_size = 128
    batch = 16

    key = jax.random.PRNGKey(0)
    kx, kwt, kbt, kwg, kbg = jax.random.split(key, 5)

    x = jax.random.normal(kx, (batch, feature_size), dtype=jnp.float32)
    # PyTorch-shaped params: Linear weight is (out, in), bias is (out,).
    bound = 1.0 / (feature_size ** 0.5)
    wt = jax.random.uniform(kwt, (feature_size, feature_size), jnp.float32, -bound, bound)
    bt = jax.random.uniform(kbt, (feature_size,), jnp.float32, -bound, bound)
    wg = jax.random.uniform(kwg, (feature_size, feature_size), jnp.float32, -bound, bound)
    bg = jax.random.uniform(kbg, (feature_size,), jnp.float32, -bound, bound)

    ref = highway_ref(x, wt, bt, wg, bg)

    # Validation path: f32 matmul, exact sigmoid, f32 output.  Tight tolerance
    # (not bit-exact: f32 MXU matmuls use a multi-pass bf16 decomposition).
    out_f32 = highway_cell(x, wt, bt, wg, bg, matmul_dtype=jnp.float32,
                           out_dtype=jnp.float32, approx_sigmoid=False)
    out_f32 = jax.block_until_ready(out_f32)
    assert jnp.allclose(out_f32, ref, atol=1e-5, rtol=1e-5), "f32 path mismatch vs reference"

    # Default fast path: bf16 matmul + bf16 writeback + EUP approx-reciprocal
    # sigmoid; fused params prepared once and reused (hoisted weight prep).
    w_cat, b_cat = prepare_highway_params(wt, bt, wg, bg)
    out_bf16 = highway_cell_fused(x, w_cat, b_cat)
    out_bf16 = jax.block_until_ready(out_bf16)
    assert jnp.allclose(out_bf16.astype(jnp.float32), ref, atol=4e-2, rtol=4e-2), \
        "bf16 path mismatch vs reference"

    print("KERNEL_OK")
</pallas_src>

<mosaic_0001>
module attributes {stable_mosaic.version = 11 : i64} {
  func.func @highway_kernel(%arg0: i32, %arg1: memref<16x128xf32, #tpu.memory_space<vmem>>, %arg2: memref<128x256xf32, #tpu.memory_space<vmem>>, %arg3: memref<1x256xf32, #tpu.memory_space<vmem>>, %arg4: memref<16x128xf32, #tpu.memory_space<vmem>>) attributes {dimension_semantics = [#tpu.dimension_semantics<parallel>], iteration_bounds = array<i64: 1>, scalar_prefetch = 0 : i64, scratch_operands = 0 : i64, tpu.core_type = #tpu.core_type<tc>, window_params = [{transform_indices = @transform_0, window_bounds = array<i64: 16, 128>}, {pipeline_mode = #tpu.pipeline_mode<synchronous>, transform_indices = @transform_1, window_bounds = array<i64: 128, 256>}, {pipeline_mode = #tpu.pipeline_mode<synchronous>, transform_indices = @transform_2, window_bounds = array<i64: 1, 256>}, {transform_indices = @transform_3, window_bounds = array<i64: 16, 128>}]} {
    %c0 = arith.constant 0 : index
    %c0_0 = arith.constant 0 : index
    %0 = vector.load %arg1[%c0, %c0_0] : memref<16x128xf32, #tpu.memory_space<vmem>>, vector<16x128xf32>
    %c0_1 = arith.constant 0 : index
    %c0_2 = arith.constant 0 : index
    %1 = vector.load %arg2[%c0_1, %c0_2] : memref<128x256xf32, #tpu.memory_space<vmem>>, vector<128x256xf32>
    %cst = arith.constant dense<0.000000e+00> : vector<16x256xf32>
    %2 = tpu.matmul %0, %1, %cst {dimension_numbers = #tpu.dot_dimension_numbers<[1], [0], [0], [1], [0, 0, 1, 1], [], []>} : vector<16x128xf32>, vector<128x256xf32>, vector<16x256xf32> -> vector<16x256xf32>
    %c0_3 = arith.constant 0 : index
    %c0_4 = arith.constant 0 : index
    %3 = vector.load %arg3[%c0_3, %c0_4] : memref<1x256xf32, #tpu.memory_space<vmem>>, vector<1x256xf32>
    %4 = vector.broadcast %3 : vector<1x256xf32> to vector<16x256xf32>
    %5 = arith.addf %2, %4 : vector<16x256xf32>
    %6 = vector.extract_strided_slice %5 {offsets = [0, 0], sizes = [16, 128], strides = [1, 1]} : vector<16x256xf32> to vector<16x128xf32>
    %cst_5 = arith.constant 0.000000e+00 : f32
    %7 = vector.broadcast %cst_5 : f32 to vector<16x128xf32>
    %8 = arith.maximumf %6, %7 : vector<16x128xf32>
    %9 = vector.extract_strided_slice %5 {offsets = [0, 128], sizes = [16, 128], strides = [1, 1]} : vector<16x256xf32> to vector<16x128xf32>
    %cst_6 = arith.constant 0.000000e+00 : f32
    %10 = vector.broadcast %cst_6 : f32 to vector<16x128xf32>
    %11 = arith.subf %10, %9 : vector<16x128xf32>
    %12 = math.exp %11 : vector<16x128xf32>
    %cst_7 = arith.constant 1.000000e+00 : f32
    %13 = vector.broadcast %cst_7 : f32 to vector<16x128xf32>
    %14 = arith.addf %13, %12 : vector<16x128xf32>
    %cst_8 = arith.constant 1.000000e+00 : f32
    %15 = vector.broadcast %cst_8 : f32 to vector<16x128xf32>
    %16 = arith.divf %15, %14 : vector<16x128xf32>
    %17 = arith.subf %8, %0 : vector<16x128xf32>
    %18 = arith.mulf %16, %17 : vector<16x128xf32>
    %19 = arith.addf %0, %18 : vector<16x128xf32>
    %c0_9 = arith.constant 0 : index
    %c0_10 = arith.constant 0 : index
    %20 = vector.load %arg4[%c0_9, %c0_10] : memref<16x128xf32, #tpu.memory_space<vmem>>, vector<16x128xf32>
    tpu.vector_store %arg4[%c0_9, %c0_10], %19 {strides = array<i32>} : memref<16x128xf32, #tpu.memory_space<vmem>>, vector<16x128xf32>,
    return
  }
  func.func @transform_0(%arg0: i32) -> (i32, i32) {
    %c0_i32 = arith.constant 0 : i32
    %c0_i32_0 = arith.constant 0 : i32
    return %arg0, %c0_i32 : i32, i32
  }
  func.func @transform_1(%arg0: i32) -> (i32, i32) {
    %c0_i32 = arith.constant 0 : i32
    %c0_i32_0 = arith.constant 0 : i32
    %c0_i32_1 = arith.constant 0 : i32
    return %c0_i32, %c0_i32_0 : i32, i32
  }
  func.func @transform_2(%arg0: i32) -> (i32, i32) {
    %c0_i32 = arith.constant 0 : i32
    %c0_i32_0 = arith.constant 0 : i32
    %c0_i32_1 = arith.constant 0 : i32
    return %c0_i32, %c0_i32_0 : i32, i32
  }
  func.func @transform_3(%arg0: i32) -> (i32, i32) {
    %c0_i32 = arith.constant 0 : i32
    %c0_i32_0 = arith.constant 0 : i32
    return %arg0, %c0_i32 : i32, i32
  }
}

module attributes {stable_mosaic.version = 11 : i64} {
  func.func @highway_kernel(%arg0: i32, %arg1: memref<16x128xf32, #tpu.memory_space<vmem>>, %arg2: memref<128x256xf32, #tpu.memory_space<vmem>>, %arg3: memref<1x256xf32, #tpu.memory_space<vmem>>, %arg4: memref<16x128xf32, #tpu.memory_space<vmem>>) attributes {dimension_semantics = [#tpu.dimension_semantics<parallel>], iteration_bounds = array<i64: 1>, scalar_prefetch = 0 : i64, scratch_operands = 0 : i64, tpu.core_type = #tpu.core_type<tc>, window_params = [{transform_indices = @transform_0, window_bounds = array<i64: 16, 128>}, {pipeline_mode = #tpu.pipeline_mode<synchronous>, transform_indices = @transform_1, window_bounds = array<i64: 128, 256>}, {pipeline_mode = #tpu.pipeline_mode<synchronous>, transform_indices = @transform_2, window_bounds = array<i64: 1, 256>}, {transform_indices = @transform_3, window_bounds = array<i64: 16, 128>}]} {
    %c0 = arith.constant 0 : index
    %c0_0 = arith.constant 0 : index
    %0 = vector.load %arg1[%c0, %c0_0] : memref<16x128xf32, #tpu.memory_space<vmem>>, vector<16x128xf32>
    %c0_1 = arith.constant 0 : index
    %c0_2 = arith.constant 0 : index
    %1 = vector.load %arg2[%c0_1, %c0_2] : memref<128x256xf32, #tpu.memory_space<vmem>>, vector<128x256xf32>
    %cst = arith.constant dense<0.000000e+00> : vector<16x256xf32>
    %2 = tpu.matmul %0, %1, %cst {dimension_numbers = #tpu.dot_dimension_numbers<[1], [0], [0], [1], [0, 0, 1, 1], [], []>} : vector<16x128xf32>, vector<128x256xf32>, vector<16x256xf32> -> vector<16x256xf32>
    %c0_3 = arith.constant 0 : index
    %c0_4 = arith.constant 0 : index
    %3 = vector.load %arg3[%c0_3, %c0_4] : memref<1x256xf32, #tpu.memory_space<vmem>>, vector<1x256xf32>
    %4 = vector.broadcast %3 : vector<1x256xf32> to vector<16x256xf32>
    %5 = arith.addf %2, %4 : vector<16x256xf32>
    %6 = vector.extract_strided_slice %5 {offsets = [0, 0], sizes = [16, 128], strides = [1, 1]} : vector<16x256xf32> to vector<16x128xf32>
    %cst_5 = arith.constant 0.000000e+00 : f32
    %7 = vector.broadcast %cst_5 : f32 to vector<16x128xf32>
    %8 = arith.maximumf %6, %7 : vector<16x128xf32>
    %9 = vector.extract_strided_slice %5 {offsets = [0, 128], sizes = [16, 128], strides = [1, 1]} : vector<16x256xf32> to vector<16x128xf32>
    %cst_6 = arith.constant 0.000000e+00 : f32
    %10 = vector.broadcast %cst_6 : f32 to vector<16x128xf32>
    %11 = arith.subf %10, %9 : vector<16x128xf32>
    %12 = math.exp %11 : vector<16x128xf32>
    %cst_7 = arith.constant 1.000000e+00 : f32
    %13 = vector.broadcast %cst_7 : f32 to vector<16x128xf32>
    %14 = arith.addf %13, %12 : vector<16x128xf32>
    %cst_8 = arith.constant 1.000000e+00 : f32
    %15 = vector.broadcast %cst_8 : f32 to vector<16x128xf32>
    %16 = arith.divf %15, %14 : vector<16x128xf32>
    %17 = arith.subf %8, %0 : vector<16x128xf32>
    %18 = arith.mulf %16, %17 : vector<16x128xf32>
    %19 = arith.addf %0, %18 : vector<16x128xf32>
    %c0_9 = arith.constant 0 : index
    %c0_10 = arith.constant 0 : index
    %20 = vector.load %arg4[%c0_9, %c0_10] : memref<16x128xf32, #tpu.memory_space<vmem>>, vector<16x128xf32>
    tpu.vector_store %arg4[%c0_9, %c0_10], %19 {strides = array<i32>} : memref<16x128xf32, #tpu.memory_space<vmem>>, vector<16x128xf32>,
    return
  }
  func.func @transform_0(%arg0: i32) -> (i32, i32) {
    %c0_i32 = arith.constant 0 : i32
    %c0_i32_0 = arith.constant 0 : i32
    return %arg0, %c0_i32 : i32, i32
  }
  func.func @transform_1(%arg0: i32) -> (i32, i32) {
    %c0_i32 = arith.constant 0 : i32
    %c0_i32_0 = arith.constant 0 : i32
    %c0_i32_1 = arith.constant 0 : i32
    return %c0_i32, %c0_i32_0 : i32, i32
  }
  func.func @transform_2(%arg0: i32) -> (i32, i32) {
    %c0_i32 = arith.constant 0 : i32
    %c0_i32_0 = arith.constant 0 : i32
    %c0_i32_1 = arith.constant 0 : i32
    return %c0_i32, %c0_i32_0 : i32, i32
  }
  func.func @transform_3(%arg0: i32) -> (i32, i32) {
    %c0_i32 = arith.constant 0 : i32
    %c0_i32_0 = arith.constant 0 : i32
    return %arg0, %c0_i32 : i32, i32
  }
}

</mosaic_0001>

<bundles_post_ra>
// kernel: tpu_custom_call.1
= control target key start
LH: loop header
LB: loop body
LE: loop exit
PB: predicated region body
PF: predicated region fallthrough
CT: control target
= control target key end

     0   :  { %8 = vsyncpa [#allocation3], 0  ;;  %s366_s0 = inlined_call_operand.hbm [shape: f32[16,128], index: 0, kind: input, shape index: {}]   ;;  %s367_s1 = inlined_call_operand.hbm [shape: f32[128,256], index: 1, kind: input, shape index: {}]   ;;  %s368_s2 = inlined_call_operand.vmem [shape: f32[1,256], index: 2, kind: input, shape index: {}]   ;;  %s369_s3 = inlined_call_operand.hbm [shape: f32[16,128], index: 3, kind: output, shape index: {}]  }
   0x1   :  { %9 = vsyncpa [#allocation6], 0 }
   0x2   :  { %10 = vsyncpa [#allocation4], 0  ;;  %s320_s12 = smov [#allocation2]  }
   0x3   :  { %s16_s13 = sshll.u32 %s320_s12, 4  ;;  %s17_s13 = int_to_ptr.vmem [resolvable:$true] %s16_s13 }
   0x4   :  { %s262_s14 = scalar_lea.vmem %s17_s13, 256  ;;  %p267_p1 = scmp.lt.s32.totalorder %s17_s13, %s17_s13 }
   0x5   :  { %p263_p0 = scmp.ne.s32.totalorder %s17_s13, %s262_s14  ;;  %p268_p2 = scmp.lt.s32.totalorder %s262_s14, %s262_s14 }
   0x7   :  { %p269_p3 = por %p268_p2, %p267_p1 }
   0x9   :  { %p270_p4 = pnand %p269_p3, %p263_p0 }
   0xb   :  { %273 = shalt.err (!%p270_p4)
}
   0xc   :  { %s321_s15 = smov 128   ;;  %s322_s16 = smov 8  }
   0xd   :  { %22 = dma.hbm_to_vmem [thread:$0]  %s366_s0, 256, %s17_s13, [#allocation3], %s321_s15, %s321_s15, %s322_s16  }
   0xe   :  { %s323_s19 = smov [#allocation5]  }
   0xf   :  { %s28_s20 = sshll.u32 %s323_s19, 4  ;;  %s29_s20 = int_to_ptr.vmem [resolvable:$true] %s28_s20 }
  0x10   :  { %s282_s21 = scalar_lea.vmem %s29_s20, 4096  ;;  %p287_p6 = scmp.lt.s32.totalorder %s29_s20, %s29_s20 }
  0x11   :  { %p283_p5 = scmp.ne.s32.totalorder %s29_s20, %s282_s21  ;;  %p288_p7 = scmp.lt.s32.totalorder %s282_s21, %s282_s21 }
  0x13   :  { %p289_p8 = por %p288_p7, %p287_p6 }
  0x15   :  { %p290_p9 = pnand %p289_p8, %p283_p5 }
  0x17   :  { %293 = shalt.err (!%p290_p9)
}
  0x18   :  { %s324_s22 = smov 256   ;;  %s325_s23 = smov 16  }
  0x19   :  { %34 = dma.hbm_to_vmem [thread:$0]  %s367_s1, 4096, %s29_s20, [#allocation6], %s324_s22, %s324_s22, %s325_s23  }
  0x1a   :  { %314 = dma.done.wait [#allocation3], 256  }
  0x1b   :  { %315 = vsyncadd [#allocation3], 4294967040 }
  0x1c   :  { %316 = dma.done.wait [#allocation6], 4096  }
  0x1d   :  { %317 = vsyncadd [#allocation6], 4294963200  ;;  %v326_v0 = vmov 0.0   ;;  %v76_v1 = vld [vmem:[#allocation5 + $0xf8] sm:$0xff]  ;;  %v75_v2 = vld [vmem:[#allocation5 + $0xf0] sm:$0xff]  ;;  %v79_v35 = vlaneseq }
  0x1e   :  { %153 = vmatprep.mubr.f32.mxu0 %v326_v0  ;;  %159 = vmatprep.mubr.f32.mxu1 %v326_v0  ;;  %v74_v3 = vld [vmem:[#allocation5 + $0xe8] sm:$0xff]  ;;  %v73_v4 = vld [vmem:[#allocation5 + $0xe0] sm:$0xff]  ;;  %v72_v5 = vld [vmem:[#allocation5 + $0xd8] sm:$0xff] }
  0x1f   :  { %89 = vmatprep.subr.mxu0 %v76_v1  ;;  %206 = vmatprep.subr.mxu1 %v76_v1  ;;  %v71_v6 = vld [vmem:[#allocation5 + $0xd0] sm:$0xff]  ;;  %v70_v7 = vld [vmem:[#allocation5 + $0xc8] sm:$0xff]  ;;  %v69_v8 = vld [vmem:[#allocation5 + $0xc0] sm:$0xff]  ;;  %v80_v36 = vshrl.u32 %v79_v35, 7 }
  0x20   :  { %90 = vmatpush1.msra.mxu0 %v75_v2  ;;  %222 = vmatpush1.msra.mxu1 %v75_v2  ;;  %v68_v9 = vld [vmem:[#allocation5 + $0xb8] sm:$0xff]  ;;  %v67_v10 = vld [vmem:[#allocation5 + $0xb0] sm:$0xff]  ;;  %v66_v11 = vld [vmem:[#allocation5 + $0xa8] sm:$0xff] }
  0x21   :  { %91 = vmatprep.subr.mxu0 %v74_v3  ;;  %207 = vmatprep.subr.mxu1 %v74_v3  ;;  %v65_v12 = vld [vmem:[#allocation5 + $0xa0] sm:$0xff]  ;;  %v64_v13 = vld [vmem:[#allocation5 + $0x98] sm:$0xff]  ;;  %v63_v14 = vld [vmem:[#allocation5 + $0x90] sm:$0xff]  ;;  %v85_v37 = vsub.s32 1, %v80_v36  ;;  %v81_v50 = vsub.s32 0, %v80_v36 }
  0x22   :  { %92 = vmatpush1.msra.mxu0 %v73_v4  ;;  %223 = vmatpush1.msra.mxu1 %v73_v4  ;;  %v62_v15 = vld [vmem:[#allocation5 + $0x88] sm:$0xff]  ;;  %v61_v16 = vld [vmem:[#allocation5 + $0x80] sm:$0xff]  ;;  %v60_v17 = vld [vmem:[#allocation5 + $0x78] sm:$0xff] }
  0x23   :  { %93 = vmatprep.subr.mxu0 %v72_v5  ;;  %208 = vmatprep.subr.mxu1 %v72_v5  ;;  %v59_v18 = vld [vmem:[#allocation5 + $0x70] sm:$0xff]  ;;  %v58_v19 = vld [vmem:[#allocation5 + $0x68] sm:$0xff]  ;;  %v57_v20 = vld [vmem:[#allocation5 + $0x60] sm:$0xff] }
  0x24   :  { %94 = vmatpush1.msra.mxu0 %v71_v6  ;;  %224 = vmatpush1.msra.mxu1 %v71_v6  ;;  %v56_v21 = vld [vmem:[#allocation5 + $0x58] sm:$0xff]  ;;  %v55_v22 = vld [vmem:[#allocation5 + $0x50] sm:$0xff]  ;;  %v54_v23 = vld [vmem:[#allocation5 + $0x48] sm:$0xff] }
  0x25   :  { %95 = vmatprep.subr.mxu0 %v70_v7  ;;  %209 = vmatprep.subr.mxu1 %v70_v7  ;;  %v53_v24 = vld [vmem:[#allocation5 + $0x40] sm:$0xff]  ;;  %v52_v25 = vld [vmem:[#allocation5 + $0x38] sm:$0xff]  ;;  %v51_v26 = vld [vmem:[#allocation5 + $0x30] sm:$0xff] }
  0x26   :  { %96 = vmatpush1.msra.mxu0 %v69_v8  ;;  %225 = vmatpush1.msra.mxu1 %v69_v8  ;;  %v50_v27 = vld [vmem:[#allocation5 + $0x28] sm:$0xff]  ;;  %v49_v28 = vld [vmem:[#allocation5 + $0x20] sm:$0xff]  ;;  %v48_v29 = vld [vmem:[#allocation5 + $0x18] sm:$0xff] }
  0x27   :  { %97 = vmatprep.subr.mxu0 %v68_v9  ;;  %210 = vmatprep.subr.mxu1 %v68_v9  ;;  %v47_v30 = vld [vmem:[#allocation5 + $0x10] sm:$0xff]  ;;  %v46_v31 = vld [vmem:[#allocation5 + $0x8] sm:$0xff]  ;;  %v45_v32 = vld [vmem:[#allocation5] sm:$0xff] }
  0x28   :  { %98 = vmatpush1.msra.mxu0 %v67_v10  ;;  %226 = vmatpush1.msra.mxu1 %v67_v10  ;;  %v43_v33 = vld [vmem:[#allocation2] sm:$0xff]  ;;  %v44_v34 = vld [vmem:[#allocation2 + $0x8] sm:$0xff] }
  0x29   :  { %99 = vmatprep.subr.mxu0 %v66_v11  ;;  %211 = vmatprep.subr.mxu1 %v66_v11  ;;  %v77_v38 = vld [vmem:[%s368_s2] sm:$0x3]  ;;  %s327_s2 = smov [#allocation7]  }
  0x2a   :  { %100 = vmatpush1.msra.mxu0 %v65_v12  ;;  %227 = vmatpush1.msra.mxu1 %v65_v12  ;;  %v86_v39 = vrot.slane %v77_v38, %v85_v37  ;;  %v82_v55 = vrot.slane %v77_v38, %v81_v50  ;;  %s193_s26 = sshll.u32 %s327_s2, 4  ;;  %s194_s26 = int_to_ptr.vmem [resolvable:$true] %s193_s26 }
  0x2b   :  { %101 = vmatprep.subr.mxu0 %v64_v13  ;;  %212 = vmatprep.subr.mxu1 %v64_v13  ;;  %s294_s27 = scalar_lea.vmem %s194_s26, 256  ;;  %p299_p11 = scmp.lt.s32.totalorder %s194_s26, %s194_s26 }
  0x2c   :  { %102 = vmatpush1.msra.mxu0 %v63_v14  ;;  %228 = vmatpush1.msra.mxu1 %v63_v14  ;;  %p295_p10 = scmp.ne.s32.totalorder %s194_s26, %s294_s27  ;;  %p300_p12 = scmp.lt.s32.totalorder %s294_s27, %s294_s27 }
  0x2d   :  { %103 = vmatprep.subr.mxu0 %v62_v15  ;;  %213 = vmatprep.subr.mxu1 %v62_v15 }
  0x2e   :  { %104 = vmatpush1.msra.mxu0 %v61_v16  ;;  %229 = vmatpush1.msra.mxu1 %v61_v16  ;;  %p301_p13 = por %p300_p12, %p299_p11 }
  0x2f   :  { %105 = vmatprep.subr.mxu0 %v60_v17  ;;  %214 = vmatprep.subr.mxu1 %v60_v17 }
  0x30   :  { %106 = vmatpush1.msra.mxu0 %v59_v18  ;;  %230 = vmatpush1.msra.mxu1 %v59_v18  ;;  %p302_p0 = pnand %p301_p13, %p295_p10 }
  0x31   :  { %107 = vmatprep.subr.mxu0 %v58_v19  ;;  %215 = vmatprep.subr.mxu1 %v58_v19 }
  0x32   :  { %108 = vmatpush1.msra.mxu0 %v57_v20  ;;  %231 = vmatpush1.msra.mxu1 %v57_v20 }
  0x33   :  { %109 = vmatprep.subr.mxu0 %v56_v21  ;;  %216 = vmatprep.subr.mxu1 %v56_v21 }
  0x34   :  { %110 = vmatpush1.msra.mxu0 %v55_v22  ;;  %232 = vmatpush1.msra.mxu1 %v55_v22 }
  0x35   :  { %111 = vmatprep.subr.mxu0 %v54_v23  ;;  %217 = vmatprep.subr.mxu1 %v54_v23 }
  0x36   :  { %112 = vmatpush1.msra.mxu0 %v53_v24  ;;  %233 = vmatpush1.msra.mxu1 %v53_v24 }
  0x37   :  { %113 = vmatprep.subr.mxu0 %v52_v25  ;;  %218 = vmatprep.subr.mxu1 %v52_v25 }
  0x38   :  { %114 = vmatpush1.msra.mxu0 %v51_v26  ;;  %234 = vmatpush1.msra.mxu1 %v51_v26 }
  0x39   :  { %115 = vmatprep.subr.mxu0 %v50_v27  ;;  %219 = vmatprep.subr.mxu1 %v50_v27 }
  0x3a   :  { %116 = vmatpush1.msra.mxu0 %v49_v28  ;;  %235 = vmatpush1.msra.mxu1 %v49_v28 }
  0x3b   :  { %117 = vmatprep.subr.mxu0 %v48_v29  ;;  %220 = vmatprep.subr.mxu1 %v48_v29 }
  0x3c   :  { %118 = vmatpush1.msra.mxu0 %v47_v30  ;;  %236 = vmatpush1.msra.mxu1 %v47_v30 }
  0x3d   :  { %119 = vmatprep.subr.mxu0 %v46_v31  ;;  %221 = vmatprep.subr.mxu1 %v46_v31 }
  0x3e   :  { %120 = vmatpush1.msra.mxu0 %v45_v32  ;;  %237 = vmatpush1.msra.mxu1 %v45_v32 }
  0x3f   :  { %154 = vmatmul.mubr.f32.vlgmr.msra.gmra.mxu0 %v43_v33  ;;  %160 = vmatmul.mubr.f32.vlgmr.msra.gmra.mxu1 %v44_v34 }
  0xff   :  { %v155_v40 = vpop.f32.mrf.mxu0  ;;  %v161_v41 = vpop.f32.mrf.mxu1 }
 0x100   :  { %v156_v56 = vadd.f32 %v155_v40, %v82_v55  ;;  %v162_v57 = vadd.f32 %v161_v41, %v82_v55 }
 0x101   :  { %v157_v42 = vpop.f32.mrf.mxu0  ;;  %v163_v43 = vpop.f32.mrf.mxu1 }
 0x102   :  { %v158_v44 = vadd.f32 %v157_v42, %v86_v39  ;;  %v164_v45 = vadd.f32 %v163_v43, %v86_v39  ;;  %v166_v58 = vmax.f32 %v156_v56, 0.0  ;;  %v167_v59 = vmax.f32 %v162_v57, 0.0 }
 0x104   :  { %v168_v46 = vsub.f32 0.0, %v158_v44  ;;  %v169_v47 = vsub.f32 0.0, %v164_v45  ;;  %v180_v60 = vsub.f32 %v166_v58, %v43_v33  ;;  %v181_v62 = vsub.f32 %v167_v59, %v44_v34 }
 0x106   :  { %v170_v48 = vmul.f32 1.442695, %v168_v46  ;;  %v172_v49 = vmul.f32 1.442695, %v169_v47 }
 0x108   :  { %246 = vpow2.f32 %v170_v48 }
 0x109   :  { %248 = vpow2.f32 %v172_v49 }
 0x115   :  { %v247_v51 = vpop.eup %246 }
 0x116   :  { %v249_v52 = vpop.eup %248  ;;  %v174_v53 = vadd.f32 1.0, %v247_v51 }
 0x117   :  { %v175_v54 = vadd.f32 1.0, %v249_v52 }
 0x118   :  { %250 = vrcp.f32 %v174_v53 }
 0x119   :  { %252 = vrcp.f32 %v175_v54 }
 0x125   :  { %v251_v61 = vpop.eup %250 }
 0x126   :  { %v253_v63 = vpop.eup %252  ;;  %v182_v0 = vmul.f32 %v251_v61, %v180_v60 }
 0x127   :  { %v183_v1 = vmul.f32 %v253_v63, %v181_v62 }
 0x128   :  { %v184_v2 = vadd.f32 %v182_v0, %v43_v33 }
 0x129   :  { %v185_v3 = vadd.f32 %v183_v1, %v44_v34 }
 0x12a   :  { %186 = vst [vmem:[#allocation7] sm:$0xff] %v184_v2 }
 0x12b   :  { %187 = vst [vmem:[#allocation7 + $0x8] sm:$0xff] %v185_v3 }
 0x12c   :  { %305 = shalt.err (!%p302_p0)
}
 0x12d   :  { %199 = dma.vmem_to_hbm [thread:$0]  %s194_s26, 256, %s369_s3, [#allocation4], %s321_s15, %s321_s15, %s322_s16  }
 0x12e   :  { %318 = dma.done.wait [#allocation4], 256  }
 0x12f   :  { %319 = vsyncadd [#allocation4], 4294967040 }
 0x130   :  { %203 = vsyncpa [#allocation3], 1 }
 0x131   :  { %204 = vsyncpa [#allocation6], 1 }
 0x132   :  { %205 = vsyncpa [#allocation4], 1 }

// kernel: tpu_custom_call.1
= control target key start
LH: loop header
LB: loop body
LE: loop exit
PB: predicated region body
PF: predicated region fallthrough
CT: control target
= control target key end

     0   :  { %8 = vsyncpa [#allocation3], 0  ;;  %s366_s0 = inlined_call_operand.hbm [shape: f32[16,128], index: 0, kind: input, shape index: {}]   ;;  %s367_s1 = inlined_call_operand.hbm [shape: f32[128,256], index: 1, kind: input, shape index: {}]   ;;  %s368_s2 = inlined_call_operand.vmem [shape: f32[1,256], index: 2, kind: input, shape index: {}]   ;;  %s369_s3 = inlined_call_operand.hbm [shape: f32[16,128], index: 3, kind: output, shape index: {}]  }
   0x1   :  { %9 = vsyncpa [#allocation6], 0 }
   0x2   :  { %10 = vsyncpa [#allocation4], 0  ;;  %s320_s12 = smov [#allocation2]  }
   0x3   :  { %s16_s13 = sshll.u32 %s320_s12, 4  ;;  %s17_s13 = int_to_ptr.vmem [resolvable:$true] %s16_s13 }
   0x4   :  { %s262_s14 = scalar_lea.vmem %s17_s13, 256  ;;  %p267_p1 = scmp.lt.s32.totalorder %s17_s13, %s17_s13 }
   0x5   :  { %p263_p0 = scmp.ne.s32.totalorder %s17_s13, %s262_s14  ;;  %p268_p2 = scmp.lt.s32.totalorder %s262_s14, %s262_s14 }
   0x7   :  { %p269_p3 = por %p268_p2, %p267_p1 }
   0x9   :  { %p270_p4 = pnand %p269_p3, %p263_p0 }
   0xb   :  { %273 = shalt.err (!%p270_p4)
}
   0xc   :  { %s321_s15 = smov 128   ;;  %s322_s16 = smov 8  }
   0xd   :  { %22 = dma.hbm_to_vmem [thread:$0]  %s366_s0, 256, %s17_s13, [#allocation3], %s321_s15, %s321_s15, %s322_s16  }
   0xe   :  { %s323_s19 = smov [#allocation5]  }
   0xf   :  { %s28_s20 = sshll.u32 %s323_s19, 4  ;;  %s29_s20 = int_to_ptr.vmem [resolvable:$true] %s28_s20 }
  0x10   :  { %s282_s21 = scalar_lea.vmem %s29_s20, 4096  ;;  %p287_p6 = scmp.lt.s32.totalorder %s29_s20, %s29_s20 }
  0x11   :  { %p283_p5 = scmp.ne.s32.totalorder %s29_s20, %s282_s21  ;;  %p288_p7 = scmp.lt.s32.totalorder %s282_s21, %s282_s21 }
  0x13   :  { %p289_p8 = por %p288_p7, %p287_p6 }
  0x15   :  { %p290_p9 = pnand %p289_p8, %p283_p5 }
  0x17   :  { %293 = shalt.err (!%p290_p9)
}
  0x18   :  { %s324_s22 = smov 256   ;;  %s325_s23 = smov 16  }
  0x19   :  { %34 = dma.hbm_to_vmem [thread:$0]  %s367_s1, 4096, %s29_s20, [#allocation6], %s324_s22, %s324_s22, %s325_s23  }
  0x1a   :  { %314 = dma.done.wait [#allocation3], 256  }
  0x1b   :  { %315 = vsyncadd [#allocation3], 4294967040 }
  0x1c   :  { %316 = dma.done.wait [#allocation6], 4096  }
  0x1d   :  { %317 = vsyncadd [#allocation6], 4294963200  ;;  %v326_v0 = vmov 0.0   ;;  %v76_v1 = vld [vmem:[#allocation5 + $0xf8] sm:$0xff]  ;;  %v75_v2 = vld [vmem:[#allocation5 + $0xf0] sm:$0xff]  ;;  %v79_v35 = vlaneseq }
  0x1e   :  { %153 = vmatprep.mubr.f32.mxu0 %v326_v0  ;;  %159 = vmatprep.mubr.f32.mxu1 %v326_v0  ;;  %v74_v3 = vld [vmem:[#allocation5 + $0xe8] sm:$0xff]  ;;  %v73_v4 = vld [vmem:[#allocation5 + $0xe0] sm:$0xff]  ;;  %v72_v5 = vld [vmem:[#allocation5 + $0xd8] sm:$0xff] }
  0x1f   :  { %89 = vmatprep.subr.mxu0 %v76_v1  ;;  %206 = vmatprep.subr.mxu1 %v76_v1  ;;  %v71_v6 = vld [vmem:[#allocation5 + $0xd0] sm:$0xff]  ;;  %v70_v7 = vld [vmem:[#allocation5 + $0xc8] sm:$0xff]  ;;  %v69_v8 = vld [vmem:[#allocation5 + $0xc0] sm:$0xff]  ;;  %v80_v36 = vshrl.u32 %v79_v35, 7 }
  0x20   :  { %90 = vmatpush1.msra.mxu0 %v75_v2  ;;  %222 = vmatpush1.msra.mxu1 %v75_v2  ;;  %v68_v9 = vld [vmem:[#allocation5 + $0xb8] sm:$0xff]  ;;  %v67_v10 = vld [vmem:[#allocation5 + $0xb0] sm:$0xff]  ;;  %v66_v11 = vld [vmem:[#allocation5 + $0xa8] sm:$0xff] }
  0x21   :  { %91 = vmatprep.subr.mxu0 %v74_v3  ;;  %207 = vmatprep.subr.mxu1 %v74_v3  ;;  %v65_v12 = vld [vmem:[#allocation5 + $0xa0] sm:$0xff]  ;;  %v64_v13 = vld [vmem:[#allocation5 + $0x98] sm:$0xff]  ;;  %v63_v14 = vld [vmem:[#allocation5 + $0x90] sm:$0xff]  ;;  %v85_v37 = vsub.s32 1, %v80_v36  ;;  %v81_v50 = vsub.s32 0, %v80_v36 }
  0x22   :  { %92 = vmatpush1.msra.mxu0 %v73_v4  ;;  %223 = vmatpush1.msra.mxu1 %v73_v4  ;;  %v62_v15 = vld [vmem:[#allocation5 + $0x88] sm:$0xff]  ;;  %v61_v16 = vld [vmem:[#allocation5 + $0x80] sm:$0xff]  ;;  %v60_v17 = vld [vmem:[#allocation5 + $0x78] sm:$0xff] }
  0x23   :  { %93 = vmatprep.subr.mxu0 %v72_v5  ;;  %208 = vmatprep.subr.mxu1 %v72_v5  ;;  %v59_v18 = vld [vmem:[#allocation5 + $0x70] sm:$0xff]  ;;  %v58_v19 = vld [vmem:[#allocation5 + $0x68] sm:$0xff]  ;;  %v57_v20 = vld [vmem:[#allocation5 + $0x60] sm:$0xff] }
  0x24   :  { %94 = vmatpush1.msra.mxu0 %v71_v6  ;;  %224 = vmatpush1.msra.mxu1 %v71_v6  ;;  %v56_v21 = vld [vmem:[#allocation5 + $0x58] sm:$0xff]  ;;  %v55_v22 = vld [vmem:[#allocation5 + $0x50] sm:$0xff]  ;;  %v54_v23 = vld [vmem:[#allocation5 + $0x48] sm:$0xff] }
  0x25   :  { %95 = vmatprep.subr.mxu0 %v70_v7  ;;  %209 = vmatprep.subr.mxu1 %v70_v7  ;;  %v53_v24 = vld [vmem:[#allocation5 + $0x40] sm:$0xff]  ;;  %v52_v25 = vld [vmem:[#allocation5 + $0x38] sm:$0xff]  ;;  %v51_v26 = vld [vmem:[#allocation5 + $0x30] sm:$0xff] }
  0x26   :  { %96 = vmatpush1.msra.mxu0 %v69_v8  ;;  %225 = vmatpush1.msra.mxu1 %v69_v8  ;;  %v50_v27 = vld [vmem:[#allocation5 + $0x28] sm:$0xff]  ;;  %v49_v28 = vld [vmem:[#allocation5 + $0x20] sm:$0xff]  ;;  %v48_v29 = vld [vmem:[#allocation5 + $0x18] sm:$0xff] }
  0x27   :  { %97 = vmatprep.subr.mxu0 %v68_v9  ;;  %210 = vmatprep.subr.mxu1 %v68_v9  ;;  %v47_v30 = vld [vmem:[#allocation5 + $0x10] sm:$0xff]  ;;  %v46_v31 = vld [vmem:[#allocation5 + $0x8] sm:$0xff]  ;;  %v45_v32 = vld [vmem:[#allocation5] sm:$0xff] }
  0x28   :  { %98 = vmatpush1.msra.mxu0 %v67_v10  ;;  %226 = vmatpush1.msra.mxu1 %v67_v10  ;;  %v43_v33 = vld [vmem:[#allocation2] sm:$0xff]  ;;  %v44_v34 = vld [vmem:[#allocation2 + $0x8] sm:$0xff] }
  0x29   :  { %99 = vmatprep.subr.mxu0 %v66_v11  ;;  %211 = vmatprep.subr.mxu1 %v66_v11  ;;  %v77_v38 = vld [vmem:[%s368_s2] sm:$0x3]  ;;  %s327_s2 = smov [#allocation7]  }
  0x2a   :  { %100 = vmatpush1.msra.mxu0 %v65_v12  ;;  %227 = vmatpush1.msra.mxu1 %v65_v12  ;;  %v86_v39 = vrot.slane %v77_v38, %v85_v37  ;;  %v82_v55 = vrot.slane %v77_v38, %v81_v50  ;;  %s193_s26 = sshll.u32 %s327_s2, 4  ;;  %s194_s26 = int_to_ptr.vmem [resolvable:$true] %s193_s26 }
  0x2b   :  { %101 = vmatprep.subr.mxu0 %v64_v13  ;;  %212 = vmatprep.subr.mxu1 %v64_v13  ;;  %s294_s27 = scalar_lea.vmem %s194_s26, 256  ;;  %p299_p11 = scmp.lt.s32.totalorder %s194_s26, %s194_s26 }
  0x2c   :  { %102 = vmatpush1.msra.mxu0 %v63_v14  ;;  %228 = vmatpush1.msra.mxu1 %v63_v14  ;;  %p295_p10 = scmp.ne.s32.totalorder %s194_s26, %s294_s27  ;;  %p300_p12 = scmp.lt.s32.totalorder %s294_s27, %s294_s27 }
  0x2d   :  { %103 = vmatprep.subr.mxu0 %v62_v15  ;;  %213 = vmatprep.subr.mxu1 %v62_v15 }
  0x2e   :  { %104 = vmatpush1.msra.mxu0 %v61_v16  ;;  %229 = vmatpush1.msra.mxu1 %v61_v16  ;;  %p301_p13 = por %p300_p12, %p299_p11 }
  0x2f   :  { %105 = vmatprep.subr.mxu0 %v60_v17  ;;  %214 = vmatprep.subr.mxu1 %v60_v17 }
  0x30   :  { %106 = vmatpush1.msra.mxu0 %v59_v18  ;;  %230 = vmatpush1.msra.mxu1 %v59_v18  ;;  %p302_p0 = pnand %p301_p13, %p295_p10 }
  0x31   :  { %107 = vmatprep.subr.mxu0 %v58_v19  ;;  %215 = vmatprep.subr.mxu1 %v58_v19 }
  0x32   :  { %108 = vmatpush1.msra.mxu0 %v57_v20  ;;  %231 = vmatpush1.msra.mxu1 %v57_v20 }
  0x33   :  { %109 = vmatprep.subr.mxu0 %v56_v21  ;;  %216 = vmatprep.subr.mxu1 %v56_v21 }
  0x34   :  { %110 = vmatpush1.msra.mxu0 %v55_v22  ;;  %232 = vmatpush1.msra.mxu1 %v55_v22 }
  0x35   :  { %111 = vmatprep.subr.mxu0 %v54_v23  ;;  %217 = vmatprep.subr.mxu1 %v54_v23 }
  0x36   :  { %112 = vmatpush1.msra.mxu0 %v53_v24  ;;  %233 = vmatpush1.msra.mxu1 %v53_v24 }
  0x37   :  { %113 = vmatprep.subr.mxu0 %v52_v25  ;;  %218 = vmatprep.subr.mxu1 %v52_v25 }
  0x38   :  { %114 = vmatpush1.msra.mxu0 %v51_v26  ;;  %234 = vmatpush1.msra.mxu1 %v51_v26 }
  0x39   :  { %115 = vmatprep.subr.mxu0 %v50_v27  ;;  %219 = vmatprep.subr.mxu1 %v50_v27 }
  0x3a   :  { %116 = vmatpush1.msra.mxu0 %v49_v28  ;;  %235 = vmatpush1.msra.mxu1 %v49_v28 }
  0x3b   :  { %117 = vmatprep.subr.mxu0 %v48_v29  ;;  %220 = vmatprep.subr.mxu1 %v48_v29 }
  0x3c   :  { %118 = vmatpush1.msra.mxu0 %v47_v30  ;;  %236 = vmatpush1.msra.mxu1 %v47_v30 }
  0x3d   :  { %119 = vmatprep.subr.mxu0 %v46_v31  ;;  %221 = vmatprep.subr.mxu1 %v46_v31 }
  0x3e   :  { %120 = vmatpush1.msra.mxu0 %v45_v32  ;;  %237 = vmatpush1.msra.mxu1 %v45_v32 }
  0x3f   :  { %154 = vmatmul.mubr.f32.vlgmr.msra.gmra.mxu0 %v43_v33  ;;  %160 = vmatmul.mubr.f32.vlgmr.msra.gmra.mxu1 %v44_v34 }
  0xff   :  { %v155_v40 = vpop.f32.mrf.mxu0  ;;  %v161_v41 = vpop.f32.mrf.mxu1 }
 0x100   :  { %v156_v56 = vadd.f32 %v155_v40, %v82_v55  ;;  %v162_v57 = vadd.f32 %v161_v41, %v82_v55 }
 0x101   :  { %v157_v42 = vpop.f32.mrf.mxu0  ;;  %v163_v43 = vpop.f32.mrf.mxu1 }
 0x102   :  { %v158_v44 = vadd.f32 %v157_v42, %v86_v39  ;;  %v164_v45 = vadd.f32 %v163_v43, %v86_v39  ;;  %v166_v58 = vmax.f32 %v156_v56, 0.0  ;;  %v167_v59 = vmax.f32 %v162_v57, 0.0 }
 0x104   :  { %v168_v46 = vsub.f32 0.0, %v158_v44  ;;  %v169_v47 = vsub.f32 0.0, %v164_v45  ;;  %v180_v60 = vsub.f32 %v166_v58, %v43_v33  ;;  %v181_v62 = vsub.f32 %v167_v59, %v44_v34 }
 0x106   :  { %v170_v48 = vmul.f32 1.442695, %v168_v46  ;;  %v172_v49 = vmul.f32 1.442695, %v169_v47 }
 0x108   :  { %246 = vpow2.f32 %v170_v48 }
 0x109   :  { %248 = vpow2.f32 %v172_v49 }
 0x115   :  { %v247_v51 = vpop.eup %246 }
 0x116   :  { %v249_v52 = vpop.eup %248  ;;  %v174_v53 = vadd.f32 1.0, %v247_v51 }
 0x117   :  { %v175_v54 = vadd.f32 1.0, %v249_v52 }
 0x118   :  { %250 = vrcp.f32 %v174_v53 }
 0x119   :  { %252 = vrcp.f32 %v175_v54 }
 0x125   :  { %v251_v61 = vpop.eup %250 }
 0x126   :  { %v253_v63 = vpop.eup %252  ;;  %v182_v0 = vmul.f32 %v251_v61, %v180_v60 }
 0x127   :  { %v183_v1 = vmul.f32 %v253_v63, %v181_v62 }
 0x128   :  { %v184_v2 = vadd.f32 %v182_v0, %v43_v33 }
 0x129   :  { %v185_v3 = vadd.f32 %v183_v1, %v44_v34 }
 0x12a   :  { %186 = vst [vmem:[#allocation7] sm:$0xff] %v184_v2 }
 0x12b   :  { %187 = vst [vmem:[#allocation7 + $0x8] sm:$0xff] %v185_v3 }
 0x12c   :  { %305 = shalt.err (!%p302_p0)
}
 0x12d   :  { %199 = dma.vmem_to_hbm [thread:$0]  %s194_s26, 256, %s369_s3, [#allocation4], %s321_s15, %s321_s15, %s322_s16  }
 0x12e   :  { %318 = dma.done.wait [#allocation4], 256  }
 0x12f   :  { %319 = vsyncadd [#allocation4], 4294967040 }
 0x130   :  { %203 = vsyncpa [#allocation3], 1 }
 0x131   :  { %204 = vsyncpa [#allocation6], 1 }
 0x132   :  { %205 = vsyncpa [#allocation4], 1 }

</bundles_post_ra>
